<compile_context>
chip_gen: v7x
topology: tpu7x:2x2x1
jax: 0.10.0
libtpu: 0.0.40
codegen_flags: <defaults>
</compile_context>

<pallas_src>
import jax
import jax.numpy as jnp
from jax.experimental import pallas as pl
from jax.experimental.pallas import tpu as pltpu

HIDDEN = 256


def _round_up(x, m):
    return ((x + m - 1) // m) * m


def mlp_kernel(x_ref, w1_ref, b1_ref, w2_ref, b2_ref, w3_ref, b3_ref, o_ref):
    # Layer 1 + 2: bf16 MXU matmuls with f32 accumulation; bias/ReLU in f32 on the VPU.
    x = x_ref[...].astype(jnp.bfloat16)                      # (TB, D)
    h1 = jnp.dot(x, w1_ref[...], preferred_element_type=jnp.float32) + b1_ref[...]
    h1 = jnp.maximum(h1, 0.0)                                # (TB, 256) f32
    h2 = jnp.dot(h1.astype(jnp.bfloat16), w2_ref[...],
                 preferred_element_type=jnp.float32) + b2_ref[...]
    h2 = jnp.maximum(h2, 0.0)                                # (TB, 256) f32
    # Layer 3 (out_features=1): VPU multiply + lane reduce instead of an N=1 MXU matmul.
    y = jnp.sum(h2 * w3_ref[...], axis=-1)                   # (TB,)
    # Lane-dense (1, TB) store (TB is a multiple of 128 -> unmasked vst).
    o_ref[...] = y[None, :] + b3_ref[...]


def value_network_returns_forward(x, params, tb=None):
    """x: (B, D) float32. params: (in,out) weights, (1,out) biases (PyTorch-equivalent)."""
    B, D = x.shape
    H = params["w2"].shape[0]

    # Tile size: multiple of 128 lanes / >=128 rows for MXU M-dim; cap for VMEM (v7x has 64 MiB).
    if tb is None:
        tb = min(1024, _round_up(max(B, 1), 128))
    tb = max(128, _round_up(tb, 128))
    Bp = _round_up(B, tb)
    num_tiles = Bp // tb
    if Bp != B:
        x = jnp.pad(x, ((0, Bp - B), (0, 0)))

    # Weights resident in VMEM; matmul weights stored bf16 (MXU-native on v6e/v7x, halves bytes).
    w1 = params["w1"].astype(jnp.bfloat16)                   # (D, H)
    w2 = params["w2"].astype(jnp.bfloat16)                   # (H, H)
    b1 = params["b1"].astype(jnp.float32)                    # (1, H)
    b2 = params["b2"].astype(jnp.float32)                    # (1, H)
    w3_row = params["w3"].reshape(1, H).astype(jnp.float32)  # (1, H)
    b3 = params["b3"].reshape(1, 1).astype(jnp.float32)      # (1, 1)

    # Advisory cost estimate so XLA can overlap producers with this mem-bound kernel.
    flops = 2 * Bp * (D * H + H * H + H)
    weight_bytes = w1.size * 2 + w2.size * 2 + (b1.size + b2.size + w3_row.size + b3.size) * 4
    cost = pl.CostEstimate(flops=flops, transcendentals=0,
                           bytes_accessed=Bp * D * 4 + Bp * 4 + weight_bytes)

    # VMEM budget: double-buffered x/out tiles + resident weights + h1/h2 staging, 2x headroom.
    vmem_bytes = (2 * tb * D * 4 + 2 * tb * 4 + weight_bytes + 2 * tb * H * 4)
    vmem_limit = int(min(max(2 * vmem_bytes, 16 * 1024 * 1024), 48 * 1024 * 1024))

    const2 = lambda i: (0, 0)
    out = pl.pallas_call(
        mlp_kernel,
        out_shape=jax.ShapeDtypeStruct((1, Bp), jnp.float32),
        grid=(num_tiles,),
        in_specs=[
            pl.BlockSpec((tb, D), lambda i: (i, 0)),   # x: streamed per grid step
            pl.BlockSpec((D, H), const2),              # w1: resident
            pl.BlockSpec((1, H), const2),              # b1: resident
            pl.BlockSpec((H, H), const2),              # w2: resident
            pl.BlockSpec((1, H), const2),              # b2: resident
            pl.BlockSpec((1, H), const2),              # w3 row: resident
            pl.BlockSpec((1, 1), const2),              # b3: resident
        ],
        out_specs=pl.BlockSpec((1, tb), lambda i: (0, i)),   # lane-dense output slab
        compiler_params=pltpu.CompilerParams(
            dimension_semantics=("parallel",),
            vmem_limit_bytes=vmem_limit,
        ),
        cost_estimate=cost,
    )(x, w1, b1, w2, b2, w3_row, b3)

    return out.reshape(Bp, 1)[:B]


def init_params(key, input_shape, hidden=HIDDEN):
    """Deterministic synthetic init matching the nn.Linear shapes of the module."""
    ks = jax.random.split(key, 6)

    def lin(kw, kb, fan_in, fan_out):
        bound = 1.0 / jnp.sqrt(fan_in)
        w = jax.random.uniform(kw, (fan_in, fan_out), jnp.float32, -bound, bound)
        b = jax.random.uniform(kb, (1, fan_out), jnp.float32, -bound, bound)
        return w, b

    w1, b1 = lin(ks[0], ks[1], input_shape, hidden)
    w2, b2 = lin(ks[2], ks[3], hidden, hidden)
    w3, b3 = lin(ks[4], ks[5], hidden, 1)
    return {"w1": w1, "b1": b1, "w2": w2, "b2": b2, "w3": w3, "b3": b3}


def reference_forward(x, p):
    h1 = jnp.maximum(x @ p["w1"] + p["b1"], 0.0)
    h2 = jnp.maximum(h1 @ p["w2"] + p["b2"], 0.0)
    return h2 @ p["w3"] + p["b3"]


if __name__ == "__main__":
    key = jax.random.PRNGKey(0)
    k_x, k_p = jax.random.split(key)

    batch, input_shape = 8, 32          # x.shape[1:] == (input_shape,)
    x = jax.random.normal(k_x, (batch, input_shape), jnp.float32)
    params = init_params(k_p, input_shape)

    out = jax.block_until_ready(value_network_returns_forward(x, params))
    ref = reference_forward(x, params)

    assert out.shape == (batch, 1), out.shape
    # Tolerance accounts for bf16 MXU operands (f32 accumulation) vs the f32 reference.
    assert jnp.allclose(out, ref, atol=5e-2, rtol=5e-2), (out, ref)

    print("KERNEL_OK")
</pallas_src>

<mosaic_0001>
module attributes {stable_mosaic.version = 11 : i64} {
  func.func @mlp_kernel(%arg0: i32, %arg1: memref<128x32xf32, #tpu.memory_space<vmem>>, %arg2: memref<32x256xbf16, #tpu.memory_space<vmem>>, %arg3: memref<1x256xf32, #tpu.memory_space<vmem>>, %arg4: memref<256x256xbf16, #tpu.memory_space<vmem>>, %arg5: memref<1x256xf32, #tpu.memory_space<vmem>>, %arg6: memref<1x256xf32, #tpu.memory_space<vmem>>, %arg7: memref<1x1xf32, #tpu.memory_space<vmem>>, %arg8: memref<1x128xf32, #tpu.memory_space<vmem>>) attributes {dimension_semantics = [#tpu.dimension_semantics<parallel>], iteration_bounds = array<i64: 1>, scalar_prefetch = 0 : i64, scratch_operands = 0 : i64, tpu.core_type = #tpu.core_type<tc>, window_params = [{transform_indices = @transform_0, window_bounds = array<i64: 128, 32>}, {pipeline_mode = #tpu.pipeline_mode<synchronous>, transform_indices = @transform_1, window_bounds = array<i64: 32, 256>}, {pipeline_mode = #tpu.pipeline_mode<synchronous>, transform_indices = @transform_2, window_bounds = array<i64: 1, 256>}, {pipeline_mode = #tpu.pipeline_mode<synchronous>, transform_indices = @transform_3, window_bounds = array<i64: 256, 256>}, {pipeline_mode = #tpu.pipeline_mode<synchronous>, transform_indices = @transform_4, window_bounds = array<i64: 1, 256>}, {pipeline_mode = #tpu.pipeline_mode<synchronous>, transform_indices = @transform_5, window_bounds = array<i64: 1, 256>}, {pipeline_mode = #tpu.pipeline_mode<synchronous>, transform_indices = @transform_6, window_bounds = array<i64: 1, 1>}, {transform_indices = @transform_7, window_bounds = array<i64: 1, 128>}]} {
    %c0 = arith.constant 0 : index
    %c0_0 = arith.constant 0 : index
    %0 = vector.load %arg1[%c0, %c0_0] : memref<128x32xf32, #tpu.memory_space<vmem>>, vector<128x32xf32>
    %1 = arith.truncf %0 : vector<128x32xf32> to vector<128x32xbf16>
    %c0_1 = arith.constant 0 : index
    %c0_2 = arith.constant 0 : index
    %2 = vector.load %arg2[%c0_1, %c0_2] : memref<32x256xbf16, #tpu.memory_space<vmem>>, vector<32x256xbf16>
    %cst = arith.constant dense<0.000000e+00> : vector<128x256xf32>
    %3 = tpu.matmul %1, %2, %cst {dimension_numbers = #tpu.dot_dimension_numbers<[1], [0], [0], [1], [0, 0, 1, 1], [], []>} : vector<128x32xbf16>, vector<32x256xbf16>, vector<128x256xf32> -> vector<128x256xf32>
    %c0_3 = arith.constant 0 : index
    %c0_4 = arith.constant 0 : index
    %4 = vector.load %arg3[%c0_3, %c0_4] : memref<1x256xf32, #tpu.memory_space<vmem>>, vector<1x256xf32>
    %5 = vector.broadcast %4 : vector<1x256xf32> to vector<128x256xf32>
    %6 = arith.addf %3, %5 : vector<128x256xf32>
    %cst_5 = arith.constant 0.000000e+00 : f32
    %7 = vector.broadcast %cst_5 : f32 to vector<128x256xf32>
    %8 = arith.maximumf %6, %7 : vector<128x256xf32>
    %9 = arith.truncf %8 : vector<128x256xf32> to vector<128x256xbf16>
    %c0_6 = arith.constant 0 : index
    %c0_7 = arith.constant 0 : index
    %10 = vector.load %arg4[%c0_6, %c0_7] : memref<256x256xbf16, #tpu.memory_space<vmem>>, vector<256x256xbf16>
    %cst_8 = arith.constant dense<0.000000e+00> : vector<128x256xf32>
    %11 = tpu.matmul %9, %10, %cst_8 {dimension_numbers = #tpu.dot_dimension_numbers<[1], [0], [0], [1], [0, 0, 1, 1], [], []>} : vector<128x256xbf16>, vector<256x256xbf16>, vector<128x256xf32> -> vector<128x256xf32>
    %c0_9 = arith.constant 0 : index
    %c0_10 = arith.constant 0 : index
    %12 = vector.load %arg5[%c0_9, %c0_10] : memref<1x256xf32, #tpu.memory_space<vmem>>, vector<1x256xf32>
    %13 = vector.broadcast %12 : vector<1x256xf32> to vector<128x256xf32>
    %14 = arith.addf %11, %13 : vector<128x256xf32>
    %cst_11 = arith.constant 0.000000e+00 : f32
    %15 = vector.broadcast %cst_11 : f32 to vector<128x256xf32>
    %16 = arith.maximumf %14, %15 : vector<128x256xf32>
    %c0_12 = arith.constant 0 : index
    %c0_13 = arith.constant 0 : index
    %17 = vector.load %arg6[%c0_12, %c0_13] : memref<1x256xf32, #tpu.memory_space<vmem>>, vector<1x256xf32>
    %18 = vector.broadcast %17 : vector<1x256xf32> to vector<128x256xf32>
    %19 = arith.mulf %16, %18 : vector<128x256xf32>
    %cst_14 = arith.constant dense<0.000000e+00> : vector<128xf32>
    %20 = vector.multi_reduction <add>, %19, %cst_14 [1] : vector<128x256xf32> to vector<128xf32>
    %21 = vector.shape_cast %20 : vector<128xf32> to vector<1x128xf32>
    %c0_15 = arith.constant 0 : index
    %c0_16 = arith.constant 0 : index
    %22 = vector.load %arg7[%c0_15, %c0_16] : memref<1x1xf32, #tpu.memory_space<vmem>>, vector<1x1xf32>
    %23 = vector.broadcast %22 : vector<1x1xf32> to vector<1x128xf32>
    %24 = arith.addf %21, %23 : vector<1x128xf32>
    %c0_17 = arith.constant 0 : index
    %c0_18 = arith.constant 0 : index
    %25 = vector.load %arg8[%c0_17, %c0_18] : memref<1x128xf32, #tpu.memory_space<vmem>>, vector<1x128xf32>
    tpu.vector_store %arg8[%c0_17, %c0_18], %24 {strides = array<i32>} : memref<1x128xf32, #tpu.memory_space<vmem>>, vector<1x128xf32>,
    return
  }
  func.func @transform_0(%arg0: i32) -> (i32, i32) {
    %c0_i32 = arith.constant 0 : i32
    %c0_i32_0 = arith.constant 0 : i32
    return %arg0, %c0_i32 : i32, i32
  }
  func.func @transform_1(%arg0: i32) -> (i32, i32) {
    %c0_i32 = arith.constant 0 : i32
    %c0_i32_0 = arith.constant 0 : i32
    %c0_i32_1 = arith.constant 0 : i32
    return %c0_i32, %c0_i32_0 : i32, i32
  }
  func.func @transform_2(%arg0: i32) -> (i32, i32) {
    %c0_i32 = arith.constant 0 : i32
    %c0_i32_0 = arith.constant 0 : i32
    %c0_i32_1 = arith.constant 0 : i32
    return %c0_i32, %c0_i32_0 : i32, i32
  }
  func.func @transform_3(%arg0: i32) -> (i32, i32) {
    %c0_i32 = arith.constant 0 : i32
    %c0_i32_0 = arith.constant 0 : i32
    %c0_i32_1 = arith.constant 0 : i32
    return %c0_i32, %c0_i32_0 : i32, i32
  }
  func.func @transform_4(%arg0: i32) -> (i32, i32) {
    %c0_i32 = arith.constant 0 : i32
    %c0_i32_0 = arith.constant 0 : i32
    %c0_i32_1 = arith.constant 0 : i32
    return %c0_i32, %c0_i32_0 : i32, i32
  }
  func.func @transform_5(%arg0: i32) -> (i32, i32) {
    %c0_i32 = arith.constant 0 : i32
    %c0_i32_0 = arith.constant 0 : i32
    %c0_i32_1 = arith.constant 0 : i32
    return %c0_i32, %c0_i32_0 : i32, i32
  }
  func.func @transform_6(%arg0: i32) -> (i32, i32) {
    %c0_i32 = arith.constant 0 : i32
    %c0_i32_0 = arith.constant 0 : i32
    %c0_i32_1 = arith.constant 0 : i32
    return %c0_i32, %c0_i32_0 : i32, i32
  }
  func.func @transform_7(%arg0: i32) -> (i32, i32) {
    %c0_i32 = arith.constant 0 : i32
    %c0_i32_0 = arith.constant 0 : i32
    return %c0_i32, %arg0 : i32, i32
  }
}

</mosaic_0001>

<bundles_post_ra>
// kernel: tpu_custom_call.1
= control target key start
LH: loop header
LB: loop body
LE: loop exit
PB: predicated region body
PF: predicated region fallthrough
CT: control target
= control target key end

     0   :  { %s1425_s0 = inlined_call_operand.vmem [shape: f32[128,32], index: 0, kind: input, shape index: {}]   ;;  %s1426_s1 = inlined_call_operand.vmem [shape: bf16[32,256], index: 1, kind: input, shape index: {}]   ;;  %s1427_s2 = inlined_call_operand.vmem [shape: f32[1,256], index: 2, kind: input, shape index: {}]   ;;  %s1428_s3 = inlined_call_operand.hbm [shape: bf16[256,256], index: 3, kind: input, shape index: {}]   ;;  %s1429_s4 = inlined_call_operand.vmem [shape: f32[1,256], index: 4, kind: input, shape index: {}]   ;;  %s1430_s5 = inlined_call_operand.vmem [shape: f32[1,256], index: 5, kind: input, shape index: {}]   ;;  %s1431_s6 = inlined_call_operand.<no memory space> [shape: f32[1,1], index: 6, kind: input, shape index: {}]   ;;  %s1432_s7 = inlined_call_operand.hbm [shape: f32[1,128], index: 7, kind: output, shape index: {}]  }
   0x1   :  { %v12_v0 = vstv %s1431_s6 }
   0x2   :  { %13 = vst [vmem:[#allocation2] sm:$0x1] %v12_v0 }
   0x3   :  { %14 = vsyncpa [#allocation4], 0 }
   0x4   :  { %15 = vsyncpa [#allocation5], 0  ;;  %s1086_s26 = smov [#allocation3]   ;;  %s1038_s30 = scalar_lea.hbm %s1428_s3, 4096 }
   0x5   :  { %s27_s27 = sshll.u32 %s1086_s26, 4  ;;  %p1039_p0 = scmp.ne.s32.totalorder %s1428_s3, %s1038_s30  ;;  %s28_s27 = int_to_ptr.vmem [resolvable:$true] %s27_s27 }
   0x6   :  { %p1042_p1 = scmp.lt.u32.totalorder %s1038_s30, %s1428_s3 }
   0x8   :  { %p1044_p2 = pnand %p1042_p1, %p1039_p0 }
   0xa   :  { %1047 = shalt.err (!%p1044_p2)
}
   0xb   :  { %s1048_s6 = scalar_lea.vmem %s28_s27, 4096  ;;  %p1053_p4 = scmp.lt.s32.totalorder %s28_s27, %s28_s27 }
   0xc   :  { %p1049_p3 = scmp.ne.s32.totalorder %s28_s27, %s1048_s6  ;;  %p1054_p5 = scmp.lt.s32.totalorder %s1048_s6, %s1048_s6 }
   0xe   :  { %p1055_p6 = por %p1054_p5, %p1053_p4 }
  0x10   :  { %p1056_p7 = pnand %p1055_p6, %p1049_p3 }
  0x12   :  { %1059 = shalt.err (!%p1056_p7)
}
  0x13   :  { %s1087_s12 = smov 128   ;;  %s1088_s13 = smov 8  }
  0x14   :  { %33 = dma.hbm_to_vmem [thread:$0]  %s1428_s3, 4096, %s28_s27, [#allocation4], %s1087_s12, %s1087_s12, %s1088_s13  }
  0x15   :  { %1082 = dma.done.wait [#allocation4], 4096  }
  0x16   :  { %1083 = vsyncadd [#allocation4], 4294963200  ;;  %v1089_v1 = vmov 0   ;;  %v984_v2 = vld [vmem:[%s1426_s1 + $0x4] ss:$8 sps:$4 sm:$0xff]   ;;  %vm104_vm0 = vcmask 261120   ;;  %v74_v62 = vlaneseq }
  0x17   :  { %161 = vmatprep.mubr.bf16.mxu0 %v1089_v1  ;;  %982 = vset.pattern.permute.xlu1 %v1089_v1  ;;  %v986_v3 = vld [vmem:[%s1426_s1] ss:$8 sps:$4 sm:$0xff]   ;;  %v987_v4 = vld [vmem:[%s1426_s1 + $0x14] ss:$8 sps:$4 sm:$0xff]   ;;  %v989_v5 = vld [vmem:[%s1426_s1 + $0x10] ss:$8 sps:$4 sm:$0xff]  }
  0x18   :  { %983 = vset.pattern.permute.xlu0 %v1089_v1  ;;  %129 = vmatprep.subr.bf16.mxu0 %v984_v2  ;;  %v44_v6 = vld [vmem:[%s1425_s0] sm:$0xff]  ;;  %v45_v7 = vld [vmem:[%s1425_s0 + $0x8] sm:$0xff]  ;;  %v46_v12 = vld [vmem:[%s1425_s0 + $0x10] sm:$0xff]  ;;  %v1225_v63 = vshrl.u32 %v74_v62, 7  ;;  %vm784_vm1 = vcmask 130112   ;;  %vm791_vm2 = vcmask 195712  }
  0x19   :  { %130 = vmatpush1.bf16.msra.mxu0 %v986_v3  ;;  %v60_v8 = vpack.c.bf16 %v45_v7, %v44_v6  ;;  %v990_v9 = vld [vmem:[#allocation3] ss:$8 sps:$4 sm:$0xff]   ;;  %v992_v10 = vld [vmem:[#allocation3 + $0x4] ss:$8 sps:$4 sm:$0xff]   ;;  %v995_v11 = vld [vmem:[#allocation3 + $0x14] ss:$8 sps:$4 sm:$0xff]  }
  0x1a   :  { %131 = vmatprep.subr.bf16.mxu0 %v987_v4  ;;  %v47_v13 = vld [vmem:[%s1425_s0 + $0x18] sm:$0xff]  ;;  %945 = vmatprep.subr.bf16.mxu1 %v992_v10  ;;  %v998_v15 = vld [vmem:[#allocation3 + $0x24] ss:$8 sps:$4 sm:$0xff]   ;;  %v996_v17 = vld [vmem:[#allocation3 + $0x20] ss:$8 sps:$4 sm:$0xff]   ;;  %v1228_v0 = vsub.s32 0, %v1225_v63 }
  0x1b   :  { %v993_v14 = vld [vmem:[#allocation3 + $0x10] ss:$8 sps:$4 sm:$0xff]   ;;  %961 = vmatpush1.bf16.msra.mxu1 %v990_v9  ;;  %v61_v16 = vpack.c.bf16 %v47_v13, %v46_v12  ;;  %v1001_v18 = vld [vmem:[#allocation3 + $0x34] ss:$8 sps:$4 sm:$0xff]   ;;  %v49_v20 = vld [vmem:[%s1425_s0 + $0x28] sm:$0xff]  ;;  %v1234_v2 = vsub.s32 1, %v1225_v63 }
  0x1c   :  { %946 = vmatprep.subr.bf16.mxu1 %v995_v11  ;;  %v48_v19 = vld [vmem:[%s1425_s0 + $0x20] sm:$0xff]  ;;  %v999_v21 = vld [vmem:[#allocation3 + $0x30] ss:$8 sps:$4 sm:$0xff]   ;;  %v53_v34 = vld [vmem:[%s1425_s0 + $0x48] sm:$0xff]  ;;  %vm798_vm3 = vcmask 261312   ;;  %vm805_vm4 = vcmask 326912  }
  0x1d   :  { %132 = vmatpush1.bf16.msra.mxu0 %v989_v5  ;;  %v1004_v22 = vld [vmem:[#allocation3 + $0x44] ss:$8 sps:$4 sm:$0xff]   ;;  %v62_v23 = vpack.c.bf16 %v49_v20, %v48_v19  ;;  %v1002_v24 = vld [vmem:[#allocation3 + $0x40] ss:$8 sps:$4 sm:$0xff]   ;;  %v1007_v25 = vld [vmem:[#allocation3 + $0x54] ss:$8 sps:$4 sm:$0xff]  }
  0x1e   :  { %494 = vmatprep.subr.bf16.mxu0 %v992_v10  ;;  %v50_v26 = vld [vmem:[%s1425_s0 + $0x30] sm:$0xff]  ;;  %v51_v27 = vld [vmem:[%s1425_s0 + $0x38] sm:$0xff]  ;;  %v1008_v31 = vld [vmem:[#allocation3 + $0x60] ss:$8 sps:$4 sm:$0xff]   ;;  %vm812_vm5 = vcmask 392512   ;;  %vm819_vm6 = vcmask 458112  }
  0x1f   :  { %962 = vmatpush1.bf16.msra.mxu1 %v993_v14  ;;  %v1005_v28 = vld [vmem:[#allocation3 + $0x50] ss:$8 sps:$4 sm:$0xff]   ;;  %v1010_v29 = vld [vmem:[#allocation3 + $0x64] ss:$8 sps:$4 sm:$0xff]   ;;  %v63_v30 = vpack.c.bf16 %v51_v27, %v50_v26  ;;  %v1013_v32 = vld [vmem:[#allocation3 + $0x74] ss:$8 sps:$4 sm:$0xff]  }
  0x20   :  { %905 = vmatmul.mubr.msk.bf16.vlgmr.msra.gmra.mrb[0].mxu0 %vm104_vm0, %v60_v8  ;;  %947 = vmatprep.subr.bf16.mxu1 %v998_v15  ;;  %v52_v33 = vld [vmem:[%s1425_s0 + $0x40] sm:$0xff]  ;;  %v1011_v35 = vld [vmem:[#allocation3 + $0x70] ss:$8 sps:$4 sm:$0xff]   ;;  %v57_v48 = vld [vmem:[%s1425_s0 + $0x68] sm:$0xff]  ;;  %vm826_vm7 = vcmask 523712   ;;  %vm833_vm8 = vcmask 589312  }
  0x21   :  { %171 = vmatprep.mubr.bf16.mxu0 %v1089_v1  ;;  %495 = vmatpush1.bf16.msra.mxu0 %v990_v9  ;;  %v1016_v36 = vld [vmem:[#allocation3 + $0x84] ss:$8 sps:$4 sm:$0xff]   ;;  %v64_v37 = vpack.c.bf16 %v53_v34, %v52_v33  ;;  %v1014_v38 = vld [vmem:[#allocation3 + $0x80] ss:$8 sps:$4 sm:$0xff]   ;;  %v1019_v39 = vld [vmem:[#allocation3 + $0x94] ss:$8 sps:$4 sm:$0xff]  }
  0x22   :  { %496 = vmatprep.subr.bf16.mxu0 %v995_v11  ;;  %v54_v40 = vld [vmem:[%s1425_s0 + $0x50] sm:$0xff]  ;;  %v55_v41 = vld [vmem:[%s1425_s0 + $0x58] sm:$0xff]  ;;  %v1020_v45 = vld [vmem:[#allocation3 + $0xa0] ss:$8 sps:$4 sm:$0xff]   ;;  %vm840_vm9 = vcmask 654912   ;;  %vm847_vm10 = vcmask 720512  }
  0x23   :  { %963 = vmatpush1.bf16.msra.mxu1 %v996_v17  ;;  %v1017_v42 = vld [vmem:[#allocation3 + $0x90] ss:$8 sps:$4 sm:$0xff]   ;;  %v1022_v43 = vld [vmem:[#allocation3 + $0xa4] ss:$8 sps:$4 sm:$0xff]   ;;  %v65_v44 = vpack.c.bf16 %v55_v41, %v54_v40  ;;  %v1025_v46 = vld [vmem:[#allocation3 + $0xb4] ss:$8 sps:$4 sm:$0xff]  }
  0x24   :  { %948 = vmatprep.subr.bf16.mxu1 %v1001_v18  ;;  %v56_v47 = vld [vmem:[%s1425_s0 + $0x60] sm:$0xff]  ;;  %v1023_v49 = vld [vmem:[#allocation3 + $0xb0] ss:$8 sps:$4 sm:$0xff]   ;;  %vm854_vm11 = vcmask 786112   ;;  %vm861_vm12 = vcmask 851712   ;;  %vm868_vm13 = vcmask 917312  }
  0x25   :  { %497 = vmatpush1.bf16.msra.mxu0 %v993_v14  ;;  %v1028_v50 = vld [vmem:[#allocation3 + $0xc4] ss:$8 sps:$4 sm:$0xff]   ;;  %v66_v51 = vpack.c.bf16 %v57_v48, %v56_v47  ;;  %v1026_v52 = vld [vmem:[#allocation3 + $0xc0] ss:$8 sps:$4 sm:$0xff]   ;;  %v1031_v53 = vld [vmem:[#allocation3 + $0xd4] ss:$8 sps:$4 sm:$0xff]  }
  0x26   :  { %498 = vmatprep.subr.bf16.mxu0 %v998_v15  ;;  %v58_v54 = vld [vmem:[%s1425_s0 + $0x70] sm:$0xff]  ;;  %v59_v55 = vld [vmem:[%s1425_s0 + $0x78] sm:$0xff]  ;;  %v1032_v59 = vld [vmem:[#allocation3 + $0xe0] ss:$8 sps:$4 sm:$0xff]   ;;  %vm875_vm14 = vcmask 982912   ;;  %vm882_vm15 = vcmask 1048512  }
  0x27   :  { %964 = vmatpush1.bf16.msra.mxu1 %v999_v21  ;;  %v1029_v56 = vld [vmem:[#allocation3 + $0xd0] ss:$8 sps:$4 sm:$0xff]   ;;  %v67_v57 = vpack.c.bf16 %v59_v55, %v58_v54  ;;  %v1034_v58 = vld [vmem:[#allocation3 + $0xe4] ss:$8 sps:$4 sm:$0xff]   ;;  %v1037_v60 = vld [vmem:[#allocation3 + $0xf4] ss:$8 sps:$4 sm:$0xff]  }
  0x28   :  { %906 = vmatmul.mubr.msk.bf16.gmra.mrb[4].mxu0 %vm104_vm0, %v61_v16  ;;  %949 = vmatprep.subr.bf16.mxu1 %v1004_v22  ;;  %v1035_v61 = vld [vmem:[#allocation3 + $0xf0] ss:$8 sps:$4 sm:$0xff]  }
  0x29   :  { %181 = vmatprep.mubr.bf16.mxu0 %v1089_v1  ;;  %499 = vmatpush1.bf16.msra.mxu0 %v996_v17 }
  0x2a   :  { %500 = vmatprep.subr.bf16.mxu0 %v1001_v18 }
  0x2b   :  { %965 = vmatpush1.bf16.msra.mxu1 %v1002_v24 }
  0x2c   :  { %950 = vmatprep.subr.bf16.mxu1 %v1007_v25 }
  0x2d   :  { %501 = vmatpush1.bf16.msra.mxu0 %v999_v21 }
  0x2e   :  { %502 = vmatprep.subr.bf16.mxu0 %v1004_v22 }
  0x2f   :  { %966 = vmatpush1.bf16.msra.mxu1 %v1005_v28 }
  0x30   :  { %907 = vmatmul.mubr.msk.bf16.gmra.mrb[8].mxu0 %vm104_vm0, %v62_v23  ;;  %951 = vmatprep.subr.bf16.mxu1 %v1010_v29 }
  0x31   :  { %191 = vmatprep.mubr.bf16.mxu0 %v1089_v1  ;;  %503 = vmatpush1.bf16.msra.mxu0 %v1002_v24 }
  0x32   :  { %504 = vmatprep.subr.bf16.mxu0 %v1007_v25 }
  0x33   :  { %967 = vmatpush1.bf16.msra.mxu1 %v1008_v31 }
  0x34   :  { %952 = vmatprep.subr.bf16.mxu1 %v1013_v32 }
  0x35   :  { %505 = vmatpush1.bf16.msra.mxu0 %v1005_v28 }
  0x36   :  { %506 = vmatprep.subr.bf16.mxu0 %v1010_v29 }
  0x37   :  { %968 = vmatpush1.bf16.msra.mxu1 %v1011_v35 }
  0x38   :  { %908 = vmatmul.mubr.msk.bf16.gmra.mrb[12].mxu0 %vm104_vm0, %v63_v30  ;;  %953 = vmatprep.subr.bf16.mxu1 %v1016_v36 }
  0x39   :  { %201 = vmatprep.mubr.bf16.mxu0 %v1089_v1  ;;  %507 = vmatpush1.bf16.msra.mxu0 %v1008_v31 }
  0x3a   :  { %508 = vmatprep.subr.bf16.mxu0 %v1013_v32 }
  0x3b   :  { %969 = vmatpush1.bf16.msra.mxu1 %v1014_v38 }
  0x3c   :  { %954 = vmatprep.subr.bf16.mxu1 %v1019_v39 }
  0x3d   :  { %509 = vmatpush1.bf16.msra.mxu0 %v1011_v35 }
  0x3e   :  { %510 = vmatprep.subr.bf16.mxu0 %v1016_v36 }
  0x3f   :  { %970 = vmatpush1.bf16.msra.mxu1 %v1017_v42 }
  0x40   :  { %909 = vmatmul.mubr.msk.bf16.gmra.mrb[16].mxu0 %vm104_vm0, %v64_v37  ;;  %955 = vmatprep.subr.bf16.mxu1 %v1022_v43 }
  0x41   :  { %211 = vmatprep.mubr.bf16.mxu0 %v1089_v1  ;;  %511 = vmatpush1.bf16.msra.mxu0 %v1014_v38 }
  0x42   :  { %512 = vmatprep.subr.bf16.mxu0 %v1019_v39 }
  0x43   :  { %971 = vmatpush1.bf16.msra.mxu1 %v1020_v45 }
  0x44   :  { %956 = vmatprep.subr.bf16.mxu1 %v1025_v46 }
  0x45   :  { %513 = vmatpush1.bf16.msra.mxu0 %v1017_v42 }
  0x46   :  { %514 = vmatprep.subr.bf16.mxu0 %v1022_v43 }
  0x47   :  { %972 = vmatpush1.bf16.msra.mxu1 %v1023_v49 }
  0x48   :  { %910 = vmatmul.mubr.msk.bf16.gmra.mrb[20].mxu0 %vm104_vm0, %v65_v44  ;;  %957 = vmatprep.subr.bf16.mxu1 %v1028_v50 }
  0x49   :  { %221 = vmatprep.mubr.bf16.mxu0 %v1089_v1  ;;  %515 = vmatpush1.bf16.msra.mxu0 %v1020_v45 }
  0x4a   :  { %516 = vmatprep.subr.bf16.mxu0 %v1025_v46 }
  0x4b   :  { %973 = vmatpush1.bf16.msra.mxu1 %v1026_v52 }
  0x4c   :  { %958 = vmatprep.subr.bf16.mxu1 %v1031_v53 }
  0x4d   :  { %517 = vmatpush1.bf16.msra.mxu0 %v1023_v49 }
  0x4e   :  { %518 = vmatprep.subr.bf16.mxu0 %v1028_v50 }
  0x4f   :  { %974 = vmatpush1.bf16.msra.mxu1 %v1029_v56 }
  0x50   :  { %911 = vmatmul.mubr.msk.bf16.gmra.mrb[24].mxu0 %vm104_vm0, %v66_v51  ;;  %959 = vmatprep.subr.bf16.mxu1 %v1034_v58 }
  0x51   :  { %231 = vmatprep.mubr.bf16.mxu0 %v1089_v1  ;;  %519 = vmatpush1.bf16.msra.mxu0 %v1026_v52  ;;  %v72_v1 = vld [vmem:[%s1427_s2] sm:$0x3] }
  0x52   :  { %520 = vmatprep.subr.bf16.mxu0 %v1031_v53  ;;  %v1237_v3 = vrot.slane %v72_v1, %v1228_v0  ;;  %v1240_v4 = vrot.slane %v72_v1, %v1234_v2 }
  0x53   :  { %975 = vmatpush1.bf16.msra.mxu1 %v1032_v59 }
  0x54   :  { %960 = vmatprep.subr.bf16.mxu1 %v1037_v60 }
  0x55   :  { %521 = vmatpush1.bf16.msra.mxu0 %v1029_v56 }
  0x56   :  { %522 = vmatprep.subr.bf16.mxu0 %v1034_v58 }
  0x57   :  { %976 = vmatpush1.bf16.msra.mxu1 %v1035_v61 }
  0x58   :  { %912 = vmatmul.mubr.msk.bf16.gmra.mrb[28].mxu0 %vm104_vm0, %v67_v57 }
  0x59   :  { %523 = vmatpush1.bf16.msra.mxu0 %v1032_v59 }
  0x5a   :  { %524 = vmatprep.subr.bf16.mxu0 %v1037_v60 }
  0x5d   :  { %525 = vmatpush1.bf16.msra.mxu0 %v1035_v61 }
  0xf3   :  { %v163_v5 = vpop.f32.mrb[0].mxu0 }
  0xf4   :  { %v164_v6 = vadd.f32 %v163_v5, %v1237_v3  ;;  %v165_v7 = vpop.f32.mrb[1].mxu0 }
  0xf5   :  { %v166_v8 = vadd.f32 %v165_v7, %v1240_v4  ;;  %v167_v9 = vpop.f32.mrb[2].mxu0 }
  0xf6   :  { %v168_v10 = vadd.f32 %v167_v9, %v1237_v3  ;;  %v169_v11 = vpop.f32.mrb[3].mxu0  ;;  %v242_v13 = vmax.f32 %v164_v6, 0.0 }
  0xf7   :  { %v170_v12 = vadd.f32 %v169_v11, %v1240_v4  ;;  %v243_v15 = vmax.f32 %v166_v8, 0.0 }
  0xf8   :  { %v244_v14 = vmax.f32 %v168_v10, 0.0 }
  0xf9   :  { %v245_v16 = vmax.f32 %v170_v12, 0.0 }
  0xfa   :  { %v274_v17 = vpack.c.bf16 %v244_v14, %v242_v13 }
  0xfb   :  { %v275_v18 = vpack.c.bf16 %v245_v16, %v243_v15  ;;  %v173_v19 = vpop.f32.mrb[4].mxu0 }
  0xfc   :  { %v174_v20 = vadd.f32 %v173_v19, %v1237_v3  ;;  %v175_v21 = vpop.f32.mrb[5].mxu0 }
  0xfd   :  { %v176_v22 = vadd.f32 %v175_v21, %v1240_v4  ;;  %v177_v23 = vpop.f32.mrb[6].mxu0  ;;  %526 = vmatprep.mubr.bf16.mxu0 %v275_v18 }
  0xfe   :  { %v178_v24 = vadd.f32 %v177_v23, %v1237_v3  ;;  %v179_v25 = vpop.f32.mrb[7].mxu0  ;;  %527 = vmatmul.mubr.bf16.vlgmr.msra.gmra.mrb[32].mxu0 %v274_v17  ;;  %v246_v27 = vmax.f32 %v174_v20, 0.0 }
  0xff   :  { %v180_v26 = vadd.f32 %v179_v25, %v1240_v4  ;;  %v247_v29 = vmax.f32 %v176_v22, 0.0 }
 0x100   :  { %v248_v28 = vmax.f32 %v178_v24, 0.0 }
 0x101   :  { %v249_v30 = vmax.f32 %v180_v26, 0.0 }
 0x102   :  { %v276_v31 = vpack.c.bf16 %v248_v28, %v246_v27 }
 0x103   :  { %v277_v32 = vpack.c.bf16 %v249_v30, %v247_v29  ;;  %v183_v33 = vpop.f32.mrb[8].mxu0 }
 0x104   :  { %v184_v34 = vadd.f32 %v183_v33, %v1237_v3  ;;  %v185_v35 = vpop.f32.mrb[9].mxu0 }
 0x105   :  { %v186_v36 = vadd.f32 %v185_v35, %v1240_v4  ;;  %v187_v37 = vpop.f32.mrb[10].mxu0  ;;  %536 = vmatprep.mubr.bf16.mxu0 %v277_v32 }
 0x106   :  { %v188_v38 = vadd.f32 %v187_v37, %v1237_v3  ;;  %v189_v39 = vpop.f32.mrb[11].mxu0  ;;  %537 = vmatmul.mubr.bf16.gmra.mrb[36].mxu0 %v276_v31  ;;  %v250_v41 = vmax.f32 %v184_v34, 0.0 }
 0x107   :  { %v190_v40 = vadd.f32 %v189_v39, %v1240_v4  ;;  %v251_v43 = vmax.f32 %v186_v36, 0.0 }
 0x108   :  { %v252_v42 = vmax.f32 %v188_v38, 0.0 }
 0x109   :  { %v253_v44 = vmax.f32 %v190_v40, 0.0 }
 0x10a   :  { %v278_v45 = vpack.c.bf16 %v252_v42, %v250_v41 }
 0x10b   :  { %v279_v46 = vpack.c.bf16 %v253_v44, %v251_v43  ;;  %v193_v47 = vpop.f32.mrb[12].mxu0 }
 0x10c   :  { %v194_v48 = vadd.f32 %v193_v47, %v1237_v3  ;;  %v195_v49 = vpop.f32.mrb[13].mxu0 }
 0x10d   :  { %v196_v50 = vadd.f32 %v195_v49, %v1240_v4  ;;  %v197_v51 = vpop.f32.mrb[14].mxu0  ;;  %546 = vmatprep.mubr.bf16.mxu0 %v279_v46 }
 0x10e   :  { %v254_v52 = vmax.f32 %v194_v48, 0.0  ;;  %v198_v53 = vadd.f32 %v197_v51, %v1237_v3  ;;  %v199_v54 = vpop.f32.mrb[15].mxu0  ;;  %547 = vmatmul.mubr.bf16.gmra.mrb[40].mxu0 %v278_v45 }
 0x10f   :  { %v255_v55 = vmax.f32 %v196_v50, 0.0  ;;  %v200_v56 = vadd.f32 %v199_v54, %v1240_v4 }
 0x110   :  { %v256_v57 = vmax.f32 %v198_v53, 0.0 }
 0x111   :  { %v257_v58 = vmax.f32 %v200_v56, 0.0 }
 0x112   :  { %v280_v59 = vpack.c.bf16 %v256_v57, %v254_v52 }
 0x113   :  { %v203_v60 = vpop.f32.mrb[16].mxu0  ;;  %v281_v61 = vpack.c.bf16 %v257_v58, %v255_v55 }
 0x114   :  { %v204_v1 = vadd.f32 %v203_v60, %v1237_v3  ;;  %v205_v5 = vpop.f32.mrb[17].mxu0 }
 0x115   :  { %v206_v6 = vadd.f32 %v205_v5, %v1240_v4  ;;  %v207_v7 = vpop.f32.mrb[18].mxu0  ;;  %556 = vmatprep.mubr.bf16.mxu1 %v281_v61 }
 0x116   :  { %v258_v8 = vmax.f32 %v204_v1, 0.0  ;;  %v208_v9 = vadd.f32 %v207_v7, %v1237_v3  ;;  %v209_v10 = vpop.f32.mrb[19].mxu0  ;;  %557 = vmatmul.mubr.bf16.vlgmr.msra.gmra.mrb[0].mxu1 %v280_v59  ;;  %v322_v59 = vld [vmem:[%s1429_s4] sm:$0x3]  ;;  %s1090_s4 = smov [#allocation6]  }
 0x117   :  { %v259_v11 = vmax.f32 %v206_v6, 0.0  ;;  %v210_v12 = vadd.f32 %v209_v10, %v1240_v4  ;;  %v1278_v60 = vrot.slane %v322_v59, %v1228_v0 }
 0x118   :  { %v260_v13 = vmax.f32 %v208_v9, 0.0 }
 0x119   :  { %v261_v14 = vmax.f32 %v210_v12, 0.0 }
 0x11a   :  { %v282_v15 = vpack.c.bf16 %v260_v13, %v258_v8 }
 0x11b   :  { %v283_v16 = vpack.c.bf16 %v261_v14, %v259_v11  ;;  %v213_v17 = vpop.f32.mrb[20].mxu0 }
 0x11c   :  { %v214_v18 = vadd.f32 %v213_v17, %v1237_v3  ;;  %v215_v19 = vpop.f32.mrb[21].mxu0 }
 0x11d   :  { %v216_v20 = vadd.f32 %v215_v19, %v1240_v4  ;;  %v217_v21 = vpop.f32.mrb[22].mxu0  ;;  %566 = vmatprep.mubr.bf16.mxu1 %v283_v16 }
 0x11e   :  { %v262_v22 = vmax.f32 %v214_v18, 0.0  ;;  %v218_v23 = vadd.f32 %v217_v21, %v1237_v3  ;;  %v219_v24 = vpop.f32.mrb[23].mxu0  ;;  %567 = vmatmul.mubr.bf16.gmra.mrb[4].mxu1 %v282_v15 }
 0x11f   :  { %v263_v25 = vmax.f32 %v216_v20, 0.0  ;;  %v220_v26 = vadd.f32 %v219_v24, %v1240_v4 }
 0x120   :  { %v264_v27 = vmax.f32 %v218_v23, 0.0 }
 0x121   :  { %v265_v28 = vmax.f32 %v220_v26, 0.0 }
 0x122   :  { %v284_v29 = vpack.c.bf16 %v264_v27, %v262_v22 }
 0x123   :  { %v285_v30 = vpack.c.bf16 %v265_v28, %v263_v25  ;;  %v223_v31 = vpop.f32.mrb[24].mxu0 }
 0x124   :  { %v224_v32 = vadd.f32 %v223_v31, %v1237_v3  ;;  %v225_v33 = vpop.f32.mrb[25].mxu0 }
 0x125   :  { %v226_v34 = vadd.f32 %v225_v33, %v1240_v4  ;;  %v227_v35 = vpop.f32.mrb[26].mxu0  ;;  %576 = vmatprep.mubr.bf16.mxu1 %v285_v30 }
 0x126   :  { %v266_v36 = vmax.f32 %v224_v32, 0.0  ;;  %v228_v37 = vadd.f32 %v227_v35, %v1237_v3  ;;  %v229_v38 = vpop.f32.mrb[27].mxu0  ;;  %577 = vmatmul.mubr.bf16.gmra.mrb[8].mxu1 %v284_v29 }
 0x127   :  { %v267_v39 = vmax.f32 %v226_v34, 0.0  ;;  %v230_v40 = vadd.f32 %v229_v38, %v1240_v4 }
 0x128   :  { %v268_v41 = vmax.f32 %v228_v37, 0.0 }
 0x129   :  { %v269_v42 = vmax.f32 %v230_v40, 0.0 }
 0x12a   :  { %v286_v43 = vpack.c.bf16 %v268_v41, %v266_v36 }
 0x12b   :  { %v287_v44 = vpack.c.bf16 %v269_v42, %v267_v39  ;;  %v233_v45 = vpop.f32.mrb[28].mxu0 }
 0x12c   :  { %v234_v46 = vadd.f32 %v233_v45, %v1237_v3  ;;  %v235_v47 = vpop.f32.mrb[29].mxu0 }
 0x12d   :  { %v236_v48 = vadd.f32 %v235_v47, %v1240_v4  ;;  %v237_v49 = vpop.f32.mrb[30].mxu0  ;;  %586 = vmatprep.mubr.bf16.mxu1 %v287_v44 }
 0x12e   :  { %v270_v50 = vmax.f32 %v234_v46, 0.0  ;;  %v238_v51 = vadd.f32 %v237_v49, %v1237_v3  ;;  %v239_v52 = vpop.f32.mrb[31].mxu0  ;;  %587 = vmatmul.mubr.bf16.gmra.mrb[12].mxu1 %v286_v43  ;;  %v1281_v3 = vrot.slane %v322_v59, %v1234_v2 }
 0x12f   :  { %v271_v53 = vmax.f32 %v236_v48, 0.0  ;;  %v240_v54 = vadd.f32 %v239_v52, %v1240_v4  ;;  %v639_v4 = vld [vmem:[%s1430_s5] sm:$0x3]  ;;  %s892_s5 = sshll.u32 %s1090_s4, 4  ;;  %s893_s5 = int_to_ptr.vmem [resolvable:$true] %s892_s5 }
 0x130   :  { %v272_v55 = vmax.f32 %v238_v51, 0.0  ;;  %v1288_v6 = vrot.slane %v639_v4, %v1228_v0  ;;  %v1292_v9 = vrot.slane %v639_v4, %v1234_v2  ;;  %s1060_s9 = scalar_lea.vmem %s893_s5, 16  ;;  %s1064_s10 = scalar_lea.vmem %s893_s5, 32 }
 0x131   :  { %v273_v56 = vmax.f32 %v240_v54, 0.0  ;;  %p1061_p8 = scmp.ne.s32.totalorder %s893_s5, %s1060_s9  ;;  %p1065_p9 = scmp.lt.s32.totalorder %s893_s5, %s893_s5 }
 0x132   :  { %v288_v57 = vpack.c.bf16 %v272_v55, %v270_v50  ;;  %p1066_p10 = scmp.lt.s32.totalorder %s1064_s10, %s1060_s9 }
 0x133   :  { %v289_v58 = vpack.c.bf16 %v273_v56, %v271_v53 }
 0x134   :  { %p1067_p11 = por %p1066_p10, %p1065_p9 }
 0x135   :  { %596 = vmatprep.mubr.bf16.mxu1 %v289_v58 }
 0x136   :  { %597 = vmatmul.mubr.bf16.gmra.mrb[16].mxu1 %v288_v57  ;;  %p1068_p12 = pnand %p1067_p11, %p1061_p8 }
 0x1d1   :  { %v528_v61 = vpop.f32.mrb[32].mxu0 }
 0x1d2   :  { %v529_v1 = vadd.f32 %v528_v61, %v1278_v60  ;;  %v530_v5 = vpop.f32.mrb[33].mxu0 }
 0x1d3   :  { %v531_v7 = vadd.f32 %v530_v5, %v1281_v3  ;;  %v532_v8 = vpop.f32.mrb[34].mxu0 }
 0x1d4   :  { %v607_v10 = vmax.f32 %v529_v1, 0.0  ;;  %v533_v11 = vadd.f32 %v532_v8, %v1278_v60  ;;  %v534_v12 = vpop.f32.mrb[35].mxu0 }
 0x1d5   :  { %v608_v13 = vmax.f32 %v531_v7, 0.0  ;;  %v535_v14 = vadd.f32 %v534_v12, %v1281_v3 }
 0x1d6   :  { %v609_v15 = vmax.f32 %v533_v11, 0.0  ;;  %v651_v16 = vmul.f32 %v1288_v6, %v607_v10 }
 0x1d7   :  { %v610_v17 = vmax.f32 %v535_v14, 0.0  ;;  %v652_v18 = vmul.f32 %v1292_v9, %v608_v13 }
 0x1d8   :  { %v653_v19 = vmul.f32 %v1288_v6, %v609_v15 }
 0x1d9   :  { %v654_v20 = vmul.f32 %v1292_v9, %v610_v17  ;;  %v538_v21 = vpop.f32.mrb[36].mxu0  ;;  %v683_v2 = vadd.f32 %v652_v18, %v651_v16 }
 0x1da   :  { %v539_v22 = vadd.f32 %v538_v21, %v1278_v60  ;;  %v540_v23 = vpop.f32.mrb[37].mxu0 }
 0x1db   :  { %v541_v24 = vadd.f32 %v540_v23, %v1281_v3  ;;  %v542_v25 = vpop.f32.mrb[38].mxu0  ;;  %684 = vadd.xlane.f32.xlu0 %v683_v2  ;;  %v686_v26 = vadd.f32 %v654_v20, %v653_v19 }
 0x1dc   :  { %v611_v27 = vmax.f32 %v539_v22, 0.0  ;;  %v543_v28 = vadd.f32 %v542_v25, %v1278_v60  ;;  %v544_v29 = vpop.f32.mrb[39].mxu0 }
 0x1dd   :  { %v612_v30 = vmax.f32 %v541_v24, 0.0  ;;  %v545_v31 = vadd.f32 %v544_v29, %v1281_v3 }
 0x1de   :  { %v613_v32 = vmax.f32 %v543_v28, 0.0  ;;  %v655_v33 = vmul.f32 %v1288_v6, %v611_v27 }
 0x1df   :  { %v614_v34 = vmax.f32 %v545_v31, 0.0  ;;  %687 = vadd.xlane.f32.xlu0 %v686_v26  ;;  %v656_v35 = vmul.f32 %v1292_v9, %v612_v30 }
 0x1e0   :  { %v657_v36 = vmul.f32 %v1288_v6, %v613_v32 }
 0x1e1   :  { %v658_v37 = vmul.f32 %v1292_v9, %v614_v34  ;;  %v548_v38 = vpop.f32.mrb[40].mxu0  ;;  %v689_v39 = vadd.f32 %v656_v35, %v655_v33 }
 0x1e2   :  { %v549_v40 = vadd.f32 %v548_v38, %v1278_v60  ;;  %v550_v41 = vpop.f32.mrb[41].mxu0 }
 0x1e3   :  { %v551_v42 = vadd.f32 %v550_v41, %v1281_v3  ;;  %v552_v43 = vpop.f32.mrb[42].mxu0  ;;  %690 = vadd.xlane.f32.xlu1 %v689_v39  ;;  %v692_v44 = vadd.f32 %v658_v37, %v657_v36 }
 0x1e4   :  { %v615_v45 = vmax.f32 %v549_v40, 0.0  ;;  %v553_v46 = vadd.f32 %v552_v43, %v1278_v60  ;;  %v554_v47 = vpop.f32.mrb[43].mxu0  ;;  %v731_v40 = vld [vmem:[#allocation2] sm:$0x1] }
 0x1e5   :  { %v616_v48 = vmax.f32 %v551_v42, 0.0  ;;  %v555_v49 = vadd.f32 %v554_v47, %v1281_v3 }
 0x1e6   :  { %v659_v50 = vmul.f32 %v1288_v6, %v615_v45  ;;  %v617_v51 = vmax.f32 %v553_v46, 0.0 }
 0x1e7   :  { %v660_v52 = vmul.f32 %v1292_v9, %v616_v48  ;;  %v618_v53 = vmax.f32 %v555_v49, 0.0  ;;  %693 = vadd.xlane.f32.xlu1 %v692_v44 }
 0x1e8   :  { %v661_v54 = vmul.f32 %v1288_v6, %v617_v51 }
 0x1e9   :  { %v662_v55 = vmul.f32 %v1292_v9, %v618_v53  ;;  %v558_v56 = vpop.f32.mrb[0].mxu1  ;;  %v695_v57 = vadd.f32 %v660_v52, %v659_v50 }
 0x1ea   :  { %v559_v58 = vadd.f32 %v558_v56, %v1278_v60  ;;  %v560_v59 = vpop.f32.mrb[1].mxu1 }
 0x1eb   :  { %v561_v4 = vadd.f32 %v560_v59, %v1281_v3  ;;  %696 = vadd.xlane.f32.xlu0 %v695_v57  ;;  %v562_v61 = vpop.f32.mrb[2].mxu1  ;;  %v698_v1 = vadd.f32 %v662_v55, %v661_v54 }
 0x1ec   :  { %v619_v5 = vmax.f32 %v559_v58, 0.0  ;;  %v563_v7 = vadd.f32 %v562_v61, %v1278_v60  ;;  %v564_v8 = vpop.f32.mrb[3].mxu1 }
 0x1ed   :  { %v620_v10 = vmax.f32 %v561_v4, 0.0  ;;  %699 = vadd.xlane.f32.xlu1 %v698_v1  ;;  %v565_v11 = vadd.f32 %v564_v8, %v1281_v3 }
 0x1ee   :  { %v663_v12 = vmul.f32 %v1288_v6, %v619_v5  ;;  %v621_v13 = vmax.f32 %v563_v7, 0.0 }
 0x1ef   :  { %v664_v14 = vmul.f32 %v1292_v9, %v620_v10  ;;  %v622_v15 = vmax.f32 %v565_v11, 0.0 }
 0x1f0   :  { %v665_v16 = vmul.f32 %v1288_v6, %v621_v13 }
 0x1f1   :  { %v666_v17 = vmul.f32 %v1292_v9, %v622_v15  ;;  %v568_v18 = vpop.f32.mrb[4].mxu1  ;;  %v701_v19 = vadd.f32 %v664_v14, %v663_v12 }
 0x1f2   :  { %v569_v20 = vadd.f32 %v568_v18, %v1278_v60  ;;  %v570_v21 = vpop.f32.mrb[5].mxu1 }
 0x1f3   :  { %v571_v2 = vadd.f32 %v570_v21, %v1281_v3  ;;  %702 = vadd.xlane.f32.xlu0 %v701_v19  ;;  %v572_v22 = vpop.f32.mrb[6].mxu1  ;;  %v704_v23 = vadd.f32 %v666_v17, %v665_v16 }
 0x1f4   :  { %v623_v24 = vmax.f32 %v569_v20, 0.0  ;;  %v573_v25 = vadd.f32 %v572_v22, %v1278_v60  ;;  %v574_v26 = vpop.f32.mrb[7].mxu1 }
 0x1f5   :  { %v624_v27 = vmax.f32 %v571_v2, 0.0  ;;  %v575_v28 = vadd.f32 %v574_v26, %v1281_v3 }
 0x1f6   :  { %v667_v29 = vmul.f32 %v1288_v6, %v623_v24  ;;  %v625_v30 = vmax.f32 %v573_v25, 0.0 }
 0x1f7   :  { %v668_v31 = vmul.f32 %v1292_v9, %v624_v27  ;;  %v626_v32 = vmax.f32 %v575_v28, 0.0  ;;  %705 = vadd.xlane.f32.xlu0 %v704_v23 }
 0x1f8   :  { %v669_v33 = vmul.f32 %v1288_v6, %v625_v30 }
 0x1f9   :  { %v670_v34 = vmul.f32 %v1292_v9, %v626_v32  ;;  %v578_v35 = vpop.f32.mrb[8].mxu1  ;;  %v707_v36 = vadd.f32 %v668_v31, %v667_v29 }
 0x1fa   :  { %v579_v37 = vadd.f32 %v578_v35, %v1278_v60  ;;  %v580_v38 = vpop.f32.mrb[9].mxu1 }
 0x1fb   :  { %v581_v39 = vadd.f32 %v580_v38, %v1281_v3  ;;  %708 = vadd.xlane.f32.xlu0 %v707_v36  ;;  %v582_v41 = vpop.f32.mrb[10].mxu1  ;;  %v710_v42 = vadd.f32 %v670_v34, %v669_v33 }
 0x1fc   :  { %v627_v43 = vmax.f32 %v579_v37, 0.0  ;;  %v583_v44 = vadd.f32 %v582_v41, %v1278_v60  ;;  %v584_v45 = vpop.f32.mrb[11].mxu1  ;;  %v1357_v41 = vand.u32 127, %v74_v62 }
 0x1fd   :  { %v628_v46 = vmax.f32 %v581_v39, 0.0  ;;  %v585_v47 = vadd.f32 %v584_v45, %v1281_v3 }
 0x1fe   :  { %v671_v48 = vmul.f32 %v1288_v6, %v627_v43  ;;  %734 = vperm.xlu1 %982, %v731_v40   ;;  %v629_v49 = vmax.f32 %v583_v44, 0.0  ;;  %v779_v43 = vadd.s32 4294967288, %v1357_v41  ;;  %v786_v44 = vadd.s32 4294967280, %v1357_v41 }
 0x1ff   :  { %v672_v50 = vmul.f32 %v1292_v9, %v628_v46  ;;  %711 = vadd.xlane.f32.xlu0 %v710_v42  ;;  %v630_v51 = vmax.f32 %v585_v47, 0.0 }
 0x200   :  { %v673_v52 = vmul.f32 %v1288_v6, %v629_v49  ;;  %v782_v62 = vsub.s32 %v779_v43, %v1225_v63 }
 0x201   :  { %v674_v53 = vmul.f32 %v1292_v9, %v630_v51  ;;  %v588_v54 = vpop.f32.mrb[12].mxu1  ;;  %v713_v55 = vadd.f32 %v672_v50, %v671_v48  ;;  %v777_v48 = vsub.s32 %v1357_v41, %v1225_v63  ;;  %v789_v50 = vsub.s32 %v786_v44, %v1225_v63 }
 0x202   :  { %v589_v56 = vadd.f32 %v588_v54, %v1278_v60  ;;  %v590_v57 = vpop.f32.mrb[13].mxu1 }
 0x203   :  { %v591_v58 = vadd.f32 %v590_v57, %v1281_v3  ;;  %714 = vadd.xlane.f32.xlu0 %v713_v55  ;;  %v592_v59 = vpop.f32.mrb[14].mxu1  ;;  %v716_v4 = vadd.f32 %v674_v53, %v673_v52  ;;  %v793_v52 = vadd.s32 4294967272, %v1357_v41  ;;  %v800_v55 = vadd.s32 4294967264, %v1357_v41 }
 0x204   :  { %v631_v61 = vmax.f32 %v589_v56, 0.0  ;;  %v593_v1 = vadd.f32 %v592_v59, %v1278_v60  ;;  %v594_v5 = vpop.f32.mrb[15].mxu1 }
 0x205   :  { %v632_v7 = vmax.f32 %v591_v58, 0.0  ;;  %v595_v8 = vadd.f32 %v594_v5, %v1281_v3  ;;  %v796_v58 = vsub.s32 %v793_v52, %v1225_v63  ;;  %v803_v5 = vsub.s32 %v800_v55, %v1225_v63 }
 0x206   :  { %v675_v10 = vmul.f32 %v1288_v6, %v631_v61  ;;  %v633_v11 = vmax.f32 %v593_v1, 0.0 }
 0x207   :  { %v676_v12 = vmul.f32 %v1292_v9, %v632_v7  ;;  %v634_v13 = vmax.f32 %v595_v8, 0.0  ;;  %v814_v8 = vadd.s32 4294967248, %v1357_v41 }
 0x208   :  { %v677_v14 = vmul.f32 %v1288_v6, %v633_v11 }
 0x209   :  { %v678_v15 = vmul.f32 %v1292_v9, %v634_v13  ;;  %v598_v16 = vpop.f32.mrb[16].mxu1  ;;  %v719_v17 = vadd.f32 %v676_v12, %v675_v10 }
 0x20a   :  { %v599_v18 = vadd.f32 %v598_v16, %v1278_v60  ;;  %v600_v19 = vpop.f32.mrb[17].mxu1  ;;  %v821_v16 = vadd.s32 4294967240, %v1357_v41 }
 0x20b   :  { %v601_v20 = vadd.f32 %v600_v19, %v1281_v3  ;;  %720 = vadd.xlane.f32.xlu0 %v719_v17  ;;  %v602_v21 = vpop.f32.mrb[18].mxu1  ;;  %v722_v2 = vadd.f32 %v678_v15, %v677_v14  ;;  %v817_v15 = vsub.s32 %v814_v8, %v1225_v63  ;;  %v828_v19 = vadd.s32 4294967232, %v1357_v41 }
 0x20c   :  { %v635_v22 = vmax.f32 %v599_v18, 0.0  ;;  %v603_v23 = vadd.f32 %v602_v21, %v1278_v60  ;;  %v604_v24 = vpop.f32.mrb[19].mxu1  ;;  %v835_v21 = vadd.s32 4294967224, %v1357_v41 }
 0x20d   :  { %v636_v25 = vmax.f32 %v601_v20, 0.0  ;;  %v605_v26 = vadd.f32 %v604_v24, %v1281_v3 }
 0x20e   :  { %v679_v27 = vmul.f32 %v1288_v6, %v635_v22  ;;  %v637_v28 = vmax.f32 %v603_v23, 0.0  ;;  %v824_v23 = vsub.s32 %v821_v16, %v1225_v63 }
 0x20f   :  { %v680_v29 = vmul.f32 %v1292_v9, %v636_v25  ;;  %v638_v30 = vmax.f32 %v605_v26, 0.0  ;;  %723 = vadd.xlane.f32.xlu0 %v722_v2  ;;  %v842_v2 = vadd.s32 4294967216, %v1357_v41  ;;  %v831_v26 = vsub.s32 %v828_v19, %v1225_v63 }
 0x210   :  { %v681_v31 = vmul.f32 %v1288_v6, %v637_v28 }
 0x211   :  { %v682_v32 = vmul.f32 %v1292_v9, %v638_v30  ;;  %v725_v33 = vadd.f32 %v680_v29, %v679_v27  ;;  %v838_v29 = vsub.s32 %v835_v21, %v1225_v63 }
 0x213   :  { %726 = vadd.xlane.f32.xlu0 %v725_v33  ;;  %v728_v34 = vadd.f32 %v682_v32, %v681_v31  ;;  %v849_v31 = vadd.s32 4294967208, %v1357_v41  ;;  %v845_v33 = vsub.s32 %v842_v2, %v1225_v63 }
 0x217   :  { %729 = vadd.xlane.f32.xlu0 %v728_v34 }
 0x222   :  { %717 = vadd.xlane.f32.xlu1 %v716_v4  ;;  %v807_v4 = vadd.s32 4294967256, %v1357_v41 }
 0x224   :  { %v810_v12 = vsub.s32 %v807_v4, %v1225_v63 }
 0x268   :  { %v685_v60 = vpop.xlane.xlu0 %684 }
 0x26c   :  { %v688_v35 = vpop.xlane.xlu0 %687 }
 0x270   :  { %v691_v36 = vpop.xlane.xlu1 %690 }
 0x274   :  { %v694_v38 = vpop.xlane.xlu1 %693 }
 0x278   :  { %v697_v3 = vpop.xlane.xlu0 %696 }
 0x27a   :  { %v700_v39 = vpop.xlane.xlu1 %699 }
 0x27e   :  { %v735_v42 = vpop.permute.xlu1 %734 }
 0x27f   :  { %v1360_v9 = vrot.slane %v735_v42, %v1228_v0  ;;  %v852_v42 = vsub.s32 %v849_v31, %v1225_v63 }
 0x280   :  { %v703_v37 = vpop.xlane.xlu0 %702 }
 0x281   :  { %v741_v46 = vadd.f32 %v1360_v9, %v685_v60  ;;  %v742_v47 = vadd.f32 %v1360_v9, %v688_v35  ;;  %v743_v49 = vadd.f32 %v1360_v9, %v691_v36  ;;  %v744_v56 = vadd.f32 %v1360_v9, %v694_v38 }
 0x282   :  { %v745_v61 = vadd.f32 %v1360_v9, %v697_v3  ;;  %v746_v10 = vadd.f32 %v1360_v9, %v700_v39  ;;  %v747_v18 = vadd.f32 %v1360_v9, %v703_v37  ;;  %v856_v60 = vadd.s32 4294967200, %v1357_v41 }
 0x283   :  { %v778_v0 = vrot.slane %v741_v46, %v777_v48  ;;  %v783_v51 = vrot.slane %v742_v47, %v782_v62  ;;  %v790_v54 = vrot.slane %v743_v49, %v789_v50  ;;  %v797_v7 = vrot.slane %v744_v56, %v796_v58 }
 0x284   :  { %v706_v40 = vpop.xlane.xlu0 %705  ;;  %v804_v13 = vrot.slane %v745_v61, %v803_v5  ;;  %v811_v20 = vrot.slane %v746_v10, %v810_v12  ;;  %v818_v25 = vrot.slane %v747_v18, %v817_v15  ;;  %v863_v36 = vadd.s32 4294967192, %v1357_v41 }
 0x285   :  { %v785_v57 = vsel %vm784_vm1, %v783_v51, %v778_v0  ;;  %v748_v24 = vadd.f32 %v1360_v9, %v706_v40  ;;  %v870_v3 = vadd.s32 4294967184, %v1357_v41  ;;  %v877_v38 = vadd.s32 4294967176, %v1357_v41 }
 0x286   :  { %v792_v1 = vsel %vm791_vm2, %v790_v54, %v785_v57  ;;  %v859_v43 = vsub.s32 %v856_v60, %v1225_v63  ;;  %v866_v47 = vsub.s32 %v863_v36, %v1225_v63 }
 0x287   :  { %v799_v11 = vsel %vm798_vm3, %v797_v7, %v792_v1  ;;  %v825_v35 = vrot.slane %v748_v24, %v824_v23  ;;  %v873_v62 = vsub.s32 %v870_v3, %v1225_v63  ;;  %v880_v0 = vsub.s32 %v877_v38, %v1225_v63 }
 0x288   :  { %v709_v6 = vpop.xlane.xlu0 %708  ;;  %v806_v17 = vsel %vm805_vm4, %v804_v13, %v799_v11 }
 0x289   :  { %v813_v22 = vsel %vm812_vm5, %v811_v20, %v806_v17  ;;  %v749_v27 = vadd.f32 %v1360_v9, %v709_v6 }
 0x28a   :  { %v820_v32 = vsel %vm819_vm6, %v818_v25, %v813_v22 }
 0x28b   :  { %v832_v37 = vrot.slane %v749_v27, %v831_v26  ;;  %v827_v39 = vsel %vm826_vm7, %v825_v35, %v820_v32 }
 0x28c   :  { %v712_v45 = vpop.xlane.xlu0 %711 }
 0x28d   :  { %v750_v30 = vadd.f32 %v1360_v9, %v712_v45  ;;  %v834_v49 = vsel %vm833_vm8, %v832_v37, %v827_v39 }
 0x28f   :  { %v839_v40 = vrot.slane %v750_v30, %v838_v29 }
 0x290   :  { %v715_v53 = vpop.xlane.xlu0 %714 }
 0x291   :  { %v751_v34 = vadd.f32 %v1360_v9, %v715_v53  ;;  %v841_v51 = vsel %vm840_vm9, %v839_v40, %v834_v49 }
 0x293   :  { %v846_v6 = vrot.slane %v751_v34, %v845_v33 }
 0x295   :  { %v848_v54 = vsel %vm847_vm10, %v846_v6, %v841_v51 }
 0x298   :  { %v721_v59 = vpop.xlane.xlu0 %720 }
 0x299   :  { %v753_v44 = vadd.f32 %v1360_v9, %v721_v59 }
 0x29b   :  { %v860_v55 = vrot.slane %v753_v44, %v859_v43 }
 0x29c   :  { %v724_v14 = vpop.xlane.xlu0 %723 }
 0x29d   :  { %v754_v48 = vadd.f32 %v1360_v9, %v724_v14 }
 0x29f   :  { %v867_v56 = vrot.slane %v754_v48, %v866_v47 }
 0x2a0   :  { %v727_v28 = vpop.xlane.xlu0 %726 }
 0x2a1   :  { %v755_v50 = vadd.f32 %v1360_v9, %v727_v28 }
 0x2a3   :  { %v874_v58 = vrot.slane %v755_v50, %v873_v62 }
 0x2a4   :  { %v730_v45 = vpop.xlane.xlu0 %729 }
 0x2a5   :  { %v756_v52 = vadd.f32 %v1360_v9, %v730_v45 }
 0x2a7   :  { %v881_v63 = vrot.slane %v756_v52, %v880_v0 }
 0x2af   :  { %v718_v46 = vpop.xlane.xlu1 %717 }
 0x2b0   :  { %v752_v41 = vadd.f32 %v1360_v9, %v718_v46 }
 0x2b2   :  { %v853_v53 = vrot.slane %v752_v41, %v852_v42 }
 0x2b4   :  { %v855_v57 = vsel %vm854_vm11, %v853_v53, %v848_v54 }
 0x2b5   :  { %v862_v59 = vsel %vm861_vm12, %v860_v55, %v855_v57 }
 0x2b6   :  { %v869_v4 = vsel %vm868_vm13, %v867_v56, %v862_v59 }
 0x2b7   :  { %v876_v61 = vsel %vm875_vm14, %v874_v58, %v869_v4 }
 0x2b8   :  { %v883_v1 = vsel %vm882_vm15, %v881_v63, %v876_v61 }
 0x2b9   :  { %885 = vst [vmem:[#allocation6] sm:$0x1] %v883_v1 }
 0x2ba   :  { %1071 = shalt.err (!%p1068_p12)
}
 0x2bb   :  { %s1072_s12 = scalar_lea.hbm %s1432_s7, 16 }
 0x2bc   :  { %p1073_p13 = scmp.ne.s32.totalorder %s1432_s7, %s1072_s12  ;;  %p1076_p0 = scmp.lt.u32.totalorder %s1072_s12, %s1432_s7 }
 0x2be   :  { %p1078_p1 = pnand %p1076_p0, %p1073_p13 }
 0x2c0   :  { %1081 = shalt.err (!%p1078_p1)
}
 0x2c1   :  { %895 = dma.vmem_to_hbm [thread:$0]  %s893_s5, 16, %s1432_s7, [#allocation5]  }
 0x2c2   :  { %1084 = dma.done.wait [#allocation5], 16  }
 0x2c3   :  { %1085 = vsyncadd [#allocation5], 4294967280 }
 0x2c4   :  { %899 = vsyncpa [#allocation4], 1 }
 0x2c5   :  { %900 = vsyncpa [#allocation5], 1 }

</bundles_post_ra>
